<compile_context>
chip_gen: v7x
topology: tpu7x:2x2x1
jax: 0.10.0
libtpu: 0.0.40
codegen_flags: <defaults>
</compile_context>

<pallas_src>
import jax
import jax.numpy as jnp
from jax.experimental import pallas as pl
from jax.experimental.pallas import tpu as pltpu


def _round_up(x, m):
    return ((x + m - 1) // m) * m


def _mlp_kernel(x_ref, w1_ref, b1_ref, w2_ref, b2_ref, out_ref, acc_ref):
    """One (batch-tile, hidden-tile) step of  out = relu(x @ W1 + b1) @ W2 + b2.

    Grid = (num_batch_tiles, num_hidden_tiles).  The hidden axis is the
    contraction axis of the second matmul, so partial products are accumulated
    into acc_ref (f32) and finalized (bias + cast + store) on the last step.
    """
    h_idx = pl.program_id(1)

    @pl.when(h_idx == 0)
    def _init():
        acc_ref[...] = jnp.zeros_like(acc_ref)

    # Matmul 1 on the MXU (bf16 operands, f32 accumulation), bias + ReLU on VPU.
    h = jnp.dot(x_ref[...], w1_ref[...], preferred_element_type=jnp.float32)
    h = jnp.maximum(h + b1_ref[...], 0.0)

    # Matmul 2 partial product over this hidden tile, accumulated in f32.
    acc_ref[...] += jnp.dot(h.astype(w2_ref.dtype), w2_ref[...],
                            preferred_element_type=jnp.float32)

    @pl.when(h_idx == pl.num_programs(1) - 1)
    def _finalize():
        out_ref[...] = (acc_ref[...] + b2_ref[...]).astype(out_ref.dtype)


def tasker_mlp(x, w1, b1, w2, b2, *,
               batch_tile=256, hidden_tile=512,
               compute_dtype=jnp.bfloat16):
    """Fused 2-layer MLP:  relu(x @ W1 + b1) @ W2 + b2  as a Pallas TPU kernel.

    x: (B, D)   w1: (D, H)   b1: (H,)   w2: (H, D)   b2: (D,)   (H = 2*D)
    """
    B, D = x.shape
    H = w1.shape[1]
    assert w1.shape == (D, H) and w2.shape == (H, D)
    assert b1.shape == (H,) and b2.shape == (D,)
    assert hidden_tile % 128 == 0 and batch_tile % 8 == 0
    out_dtype = x.dtype

    # Lane-dense padding of the feature / hidden axes (multiples of 128).
    Dp = _round_up(D, 128)
    Hp = _round_up(H, 128)

    # Batch tile: multiple of 8 (sublane), capped so activations stay small.
    TB = min(batch_tile, _round_up(B, 8))
    Bp = _round_up(B, TB)
    TH = min(hidden_tile, Hp)

    # Zero padding is exact: padded hidden units see zero weights and bias
    # (relu(0)=0 feeds zero W2 rows), padded feature lanes are sliced off.
    cdt = compute_dtype
    xp = jnp.zeros((Bp, Dp), cdt).at[:B, :D].set(x.astype(cdt))
    w1p = jnp.zeros((Dp, Hp), cdt).at[:D, :H].set(w1.astype(cdt))
    w2p = jnp.zeros((Hp, Dp), cdt).at[:H, :D].set(w2.astype(cdt))
    b1p = jnp.zeros((1, Hp), jnp.float32).at[0, :H].set(b1.astype(jnp.float32))
    b2p = jnp.zeros((1, Dp), jnp.float32).at[0, :D].set(b2.astype(jnp.float32))

    grid = (Bp // TB, Hp // TH)

    cbytes = jnp.dtype(cdt).itemsize
    obytes = jnp.dtype(out_dtype).itemsize
    # Double-buffered inputs/outputs + f32 accumulator scratch.
    vmem_est = (2 * TB * Dp * cbytes      # x
                + 2 * Dp * TH * cbytes    # W1 tile
                + 2 * TH * Dp * cbytes    # W2 tile
                + 2 * TH * 4 + 2 * Dp * 4 # biases
                + 2 * TB * Dp * obytes    # out
                + TB * Dp * 4)            # accumulator
    vmem_limit = int(min(128 * 1024 * 1024,
                         max(32 * 1024 * 1024, vmem_est + (4 << 20))))

    cost = pl.CostEstimate(
        flops=4 * Bp * Dp * Hp,            # two (Bp,Dp)x(Dp/ Hp) matmuls
        transcendentals=0,
        bytes_accessed=int(Bp * Dp * cbytes + Dp * Hp * cbytes
                           + Hp * Dp * cbytes + Hp * 4 + Dp * 4
                           + Bp * Dp * obytes),
    )

    out_padded = pl.pallas_call(
        _mlp_kernel,
        out_shape=jax.ShapeDtypeStruct((Bp, Dp), out_dtype),
        grid_spec=pltpu.PrefetchScalarGridSpec(
            num_scalar_prefetch=0,
            grid=grid,
            in_specs=[
                pl.BlockSpec((TB, Dp), lambda b, h: (b, 0)),   # x (resident over h)
                pl.BlockSpec((Dp, TH), lambda b, h: (0, h)),   # W1 hidden slice
                pl.BlockSpec((1, TH), lambda b, h: (0, h)),    # b1 hidden slice
                pl.BlockSpec((TH, Dp), lambda b, h: (h, 0)),   # W2 hidden slice
                pl.BlockSpec((1, Dp), lambda b, h: (0, 0)),    # b2 (resident)
            ],
            out_specs=pl.BlockSpec((TB, Dp), lambda b, h: (b, 0)),
            scratch_shapes=[pltpu.VMEM((TB, Dp), jnp.float32)],
        ),
        compiler_params=pltpu.CompilerParams(
            dimension_semantics=("parallel", "arbitrary"),
            vmem_limit_bytes=vmem_limit,
        ),
        cost_estimate=cost,
    )(xp, w1p, b1p, w2p, b2p)

    return out_padded[:B, :D]


class TaskerPallas:
    """JAX/Pallas port of the PyTorch `Tasker` module."""

    def __init__(self, dim, use_mlp, key):
        self.dim = dim
        self.use_mlp = use_mlp
        k_fc_w, k_fc_b, k1w, k1b, k2w, k2b = jax.random.split(key, 6)

        # nn.Linear(dim, 100) -- present in __init__, unused in forward.
        bound_fc = 1.0 / jnp.sqrt(dim)
        self.fc_w = jax.random.uniform(k_fc_w, (dim, 100), jnp.float32,
                                       -bound_fc, bound_fc)
        self.fc_b = jax.random.uniform(k_fc_b, (100,), jnp.float32,
                                       -bound_fc, bound_fc)

        if use_mlp:
            hid = dim * 2
            bound1 = 1.0 / jnp.sqrt(dim)
            bound2 = 1.0 / jnp.sqrt(hid)
            # Stored as (in, out); equivalent to PyTorch weight.T.
            self.w1 = jax.random.uniform(k1w, (dim, hid), jnp.float32,
                                         -bound1, bound1)
            self.b1 = jax.random.uniform(k1b, (hid,), jnp.float32,
                                         -bound1, bound1)
            self.w2 = jax.random.uniform(k2w, (hid, dim), jnp.float32,
                                         -bound2, bound2)
            self.b2 = jax.random.uniform(k2b, (dim,), jnp.float32,
                                         -bound2, bound2)

    def get_feature(self, x):
        # TODO(synk): abstract in the reference (`pass`); identity stand-in.
        return x

    def forward(self, x):
        feat_t = self.get_feature(x)
        if self.use_mlp:
            feat_t = tasker_mlp(feat_t, self.w1, self.b1, self.w2, self.b2)
        return (x, feat_t)


if __name__ == "__main__":
    key = jax.random.PRNGKey(0)
    k_param, k_x = jax.random.split(key)

    batch, dim = 8, 32
    model = TaskerPallas(dim=dim, use_mlp=True, key=k_param)

    x = jax.random.normal(k_x, (batch, dim), jnp.float32)

    x_out, feat_t = model.forward(x)
    jax.block_until_ready((x_out, feat_t))

    # Reference with the same bf16-operand / f32-accumulation math in plain JAX.
    xb = x.astype(jnp.bfloat16)
    w1b = model.w1.astype(jnp.bfloat16)
    w2b = model.w2.astype(jnp.bfloat16)
    h_ref = jnp.maximum(
        jnp.dot(xb, w1b, preferred_element_type=jnp.float32) + model.b1, 0.0)
    ref = jnp.dot(h_ref.astype(jnp.bfloat16), w2b,
                  preferred_element_type=jnp.float32) + model.b2

    assert feat_t.shape == (batch, dim)
    assert feat_t.dtype == x.dtype
    assert jnp.allclose(feat_t, ref, atol=1e-2, rtol=1e-2)
    assert jnp.array_equal(x_out, x)

    print("KERNEL_OK")
</pallas_src>

<mosaic_0001>
module attributes {stable_mosaic.version = 11 : i64} {
  func.func @_mlp_kernel(%arg0: i32, %arg1: i32, %arg2: memref<8x128xbf16, #tpu.memory_space<vmem>>, %arg3: memref<128x128xbf16, #tpu.memory_space<vmem>>, %arg4: memref<1x128xf32, #tpu.memory_space<vmem>>, %arg5: memref<128x128xbf16, #tpu.memory_space<vmem>>, %arg6: memref<1x128xf32, #tpu.memory_space<vmem>>, %arg7: memref<8x128xf32, #tpu.memory_space<vmem>>, %arg8: memref<8x128xf32, #tpu.memory_space<vmem>>) attributes {dimension_semantics = [#tpu.dimension_semantics<parallel>, #tpu.dimension_semantics<arbitrary>], iteration_bounds = array<i64: 1, 1>, scalar_prefetch = 0 : i64, scratch_operands = 1 : i64, tpu.core_type = #tpu.core_type<tc>, window_params = [{transform_indices = @transform_0, window_bounds = array<i64: 8, 128>}, {transform_indices = @transform_1, window_bounds = array<i64: 128, 128>}, {transform_indices = @transform_2, window_bounds = array<i64: 1, 128>}, {transform_indices = @transform_3, window_bounds = array<i64: 128, 128>}, {pipeline_mode = #tpu.pipeline_mode<synchronous>, transform_indices = @transform_4, window_bounds = array<i64: 1, 128>}, {transform_indices = @transform_5, window_bounds = array<i64: 8, 128>}]} {
    %c0_i32 = arith.constant 0 : i32
    %0 = arith.cmpi eq, %arg1, %c0_i32 : i32
    %1 = arith.extui %0 : i1 to i32
    %c0_i32_0 = arith.constant 0 : i32
    %2 = arith.cmpi ne, %1, %c0_i32_0 : i32
    scf.if %2 {
      %cst_16 = arith.constant 0.000000e+00 : f32
      %20 = vector.broadcast %cst_16 : f32 to vector<8x128xf32>
      %c0_17 = arith.constant 0 : index
      %c0_18 = arith.constant 0 : index
      %21 = vector.load %arg8[%c0_17, %c0_18] : memref<8x128xf32, #tpu.memory_space<vmem>>, vector<8x128xf32>
      tpu.vector_store %arg8[%c0_17, %c0_18], %20 {strides = array<i32>} : memref<8x128xf32, #tpu.memory_space<vmem>>, vector<8x128xf32>,
    } else {
    }
    %c0 = arith.constant 0 : index
    %c0_1 = arith.constant 0 : index
    %3 = vector.load %arg2[%c0, %c0_1] : memref<8x128xbf16, #tpu.memory_space<vmem>>, vector<8x128xbf16>
    %c0_2 = arith.constant 0 : index
    %c0_3 = arith.constant 0 : index
    %4 = vector.load %arg3[%c0_2, %c0_3] : memref<128x128xbf16, #tpu.memory_space<vmem>>, vector<128x128xbf16>
    %cst = arith.constant dense<0.000000e+00> : vector<8x128xf32>
    %5 = tpu.matmul %3, %4, %cst {dimension_numbers = #tpu.dot_dimension_numbers<[1], [0], [0], [1], [0, 0, 1, 1], [], []>} : vector<8x128xbf16>, vector<128x128xbf16>, vector<8x128xf32> -> vector<8x128xf32>
    %c0_4 = arith.constant 0 : index
    %c0_5 = arith.constant 0 : index
    %6 = vector.load %arg4[%c0_4, %c0_5] : memref<1x128xf32, #tpu.memory_space<vmem>>, vector<1x128xf32>
    %7 = vector.broadcast %6 : vector<1x128xf32> to vector<8x128xf32>
    %8 = arith.addf %5, %7 : vector<8x128xf32>
    %cst_6 = arith.constant 0.000000e+00 : f32
    %9 = vector.broadcast %cst_6 : f32 to vector<8x128xf32>
    %10 = arith.maximumf %8, %9 : vector<8x128xf32>
    %c0_7 = arith.constant 0 : index
    %c0_8 = arith.constant 0 : index
    %11 = vector.load %arg8[%c0_7, %c0_8] : memref<8x128xf32, #tpu.memory_space<vmem>>, vector<8x128xf32>
    %12 = arith.truncf %10 : vector<8x128xf32> to vector<8x128xbf16>
    %c0_9 = arith.constant 0 : index
    %c0_10 = arith.constant 0 : index
    %13 = vector.load %arg5[%c0_9, %c0_10] : memref<128x128xbf16, #tpu.memory_space<vmem>>, vector<128x128xbf16>
    %cst_11 = arith.constant dense<0.000000e+00> : vector<8x128xf32>
    %14 = tpu.matmul %12, %13, %cst_11 {dimension_numbers = #tpu.dot_dimension_numbers<[1], [0], [0], [1], [0, 0, 1, 1], [], []>} : vector<8x128xbf16>, vector<128x128xbf16>, vector<8x128xf32> -> vector<8x128xf32>
    %15 = arith.addf %11, %14 : vector<8x128xf32>
    %c0_12 = arith.constant 0 : index
    %c0_13 = arith.constant 0 : index
    %16 = vector.load %arg8[%c0_12, %c0_13] : memref<8x128xf32, #tpu.memory_space<vmem>>, vector<8x128xf32>
    tpu.vector_store %arg8[%c0_12, %c0_13], %15 {strides = array<i32>} : memref<8x128xf32, #tpu.memory_space<vmem>>, vector<8x128xf32>,
    %c0_i32_14 = arith.constant 0 : i32
    %17 = arith.cmpi eq, %arg1, %c0_i32_14 : i32
    %18 = arith.extui %17 : i1 to i32
    %c0_i32_15 = arith.constant 0 : i32
    %19 = arith.cmpi ne, %18, %c0_i32_15 : i32
    scf.if %19 {
      %c0_16 = arith.constant 0 : index
      %c0_17 = arith.constant 0 : index
      %20 = vector.load %arg8[%c0_16, %c0_17] : memref<8x128xf32, #tpu.memory_space<vmem>>, vector<8x128xf32>
      %c0_18 = arith.constant 0 : index
      %c0_19 = arith.constant 0 : index
      %21 = vector.load %arg6[%c0_18, %c0_19] : memref<1x128xf32, #tpu.memory_space<vmem>>, vector<1x128xf32>
      %22 = vector.broadcast %21 : vector<1x128xf32> to vector<8x128xf32>
      %23 = arith.addf %20, %22 : vector<8x128xf32>
      %c0_20 = arith.constant 0 : index
      %c0_21 = arith.constant 0 : index
      %24 = vector.load %arg7[%c0_20, %c0_21] : memref<8x128xf32, #tpu.memory_space<vmem>>, vector<8x128xf32>
      tpu.vector_store %arg7[%c0_20, %c0_21], %23 {strides = array<i32>} : memref<8x128xf32, #tpu.memory_space<vmem>>, vector<8x128xf32>,
    } else {
    }
    return
  }
  func.func @transform_0(%arg0: i32, %arg1: i32) -> (i32, i32) {
    %c0_i32 = arith.constant 0 : i32
    %c0_i32_0 = arith.constant 0 : i32
    return %arg0, %c0_i32 : i32, i32
  }
  func.func @transform_1(%arg0: i32, %arg1: i32) -> (i32, i32) {
    %c0_i32 = arith.constant 0 : i32
    %c0_i32_0 = arith.constant 0 : i32
    return %c0_i32, %arg1 : i32, i32
  }
  func.func @transform_2(%arg0: i32, %arg1: i32) -> (i32, i32) {
    %c0_i32 = arith.constant 0 : i32
    %c0_i32_0 = arith.constant 0 : i32
    return %c0_i32, %arg1 : i32, i32
  }
  func.func @transform_3(%arg0: i32, %arg1: i32) -> (i32, i32) {
    %c0_i32 = arith.constant 0 : i32
    %c0_i32_0 = arith.constant 0 : i32
    return %arg1, %c0_i32 : i32, i32
  }
  func.func @transform_4(%arg0: i32, %arg1: i32) -> (i32, i32) {
    %c0_i32 = arith.constant 0 : i32
    %c0_i32_0 = arith.constant 0 : i32
    %c0_i32_1 = arith.constant 0 : i32
    return %c0_i32, %c0_i32_0 : i32, i32
  }
  func.func @transform_5(%arg0: i32, %arg1: i32) -> (i32, i32) {
    %c0_i32 = arith.constant 0 : i32
    %c0_i32_0 = arith.constant 0 : i32
    return %arg0, %c0_i32 : i32, i32
  }
}

</mosaic_0001>

<bundles_post_ra>
// kernel: tpu_custom_call.1
= control target key start
LH: loop header
LB: loop body
LE: loop exit
PB: predicated region body
PF: predicated region fallthrough
CT: control target
= control target key end

     0   :  { %10 = vsyncpa [#allocation4], 0  ;;  %s608_s0 = inlined_call_operand.hbm [shape: bf16[8,128], index: 0, kind: input, shape index: {}]   ;;  %s609_s1 = inlined_call_operand.hbm [shape: bf16[128,128], index: 1, kind: input, shape index: {}]   ;;  %s610_s2 = inlined_call_operand.vmem [shape: f32[1,128], index: 2, kind: input, shape index: {}]   ;;  %s611_s3 = inlined_call_operand.hbm [shape: bf16[128,128], index: 3, kind: input, shape index: {}]   ;;  %s612_s4 = inlined_call_operand.vmem [shape: f32[1,128], index: 4, kind: input, shape index: {}]   ;;  %s613_s5 = inlined_call_operand.hbm [shape: f32[8,128], index: 5, kind: output, shape index: {}]  }
   0x1   :  { %11 = vsyncpa [#allocation7], 0 }
   0x2   :  { %12 = vsyncpa [#allocation5], 0  ;;  %s510_s18 = smov [#allocation6]   ;;  %s416_s22 = scalar_lea.hbm %s609_s1, 1024 }
   0x3   :  { %s28_s19 = sshll.u32 %s510_s18, 4  ;;  %p417_p0 = scmp.ne.s32.totalorder %s609_s1, %s416_s22  ;;  %s29_s19 = int_to_ptr.vmem [resolvable:$true] %s28_s19 }
   0x4   :  { %p420_p1 = scmp.lt.u32.totalorder %s416_s22, %s609_s1 }
   0x6   :  { %p422_p2 = pnand %p420_p1, %p417_p0 }
   0x8   :  { %425 = shalt.err (!%p422_p2)
}
   0x9   :  { %s426_s27 = scalar_lea.vmem %s29_s19, 1024  ;;  %p431_p4 = scmp.lt.s32.totalorder %s29_s19, %s29_s19 }
   0xa   :  { %p427_p3 = scmp.ne.s32.totalorder %s29_s19, %s426_s27  ;;  %p432_p5 = scmp.lt.s32.totalorder %s426_s27, %s426_s27 }
   0xc   :  { %p433_p6 = por %p432_p5, %p431_p4 }
   0xe   :  { %p434_p7 = pnand %p433_p6, %p427_p3 }
  0x10   :  { %437 = shalt.err (!%p434_p7)
}
  0x11   :  { %s511_s28 = smov 64   ;;  %s512_s29 = smov 4  }
  0x12   :  { %34 = dma.hbm_to_vmem [thread:$0]  %s609_s1, 1024, %s29_s19, [#allocation7], %s511_s28, %s511_s28, %s512_s29  }
  0x13   :  { %s513_s7 = smov [#allocation3]   ;;  %s514_s9 = smov [#allocation8]  }
  0x14   :  { %s19_s8 = sshll.u32 %s513_s7, 4  ;;  %s42_s10 = sshll.u32 %s514_s9, 4  ;;  %s20_s8 = int_to_ptr.vmem [resolvable:$true] %s19_s8  ;;  %s43_s10 = int_to_ptr.vmem [resolvable:$true] %s42_s10 }
  0x15   :  { %s438_s13 = scalar_lea.hbm %s608_s0, 64 }
  0x16   :  { %p439_p8 = scmp.ne.s32.totalorder %s608_s0, %s438_s13  ;;  %p442_p9 = scmp.lt.u32.totalorder %s438_s13, %s608_s0 }
  0x18   :  { %p444_p10 = pnand %p442_p9, %p439_p8 }
  0x1a   :  { %447 = shalt.err (!%p444_p10)
}
  0x1b   :  { %s448_s1 = scalar_lea.vmem %s20_s8, 64  ;;  %p453_p12 = scmp.lt.s32.totalorder %s20_s8, %s20_s8 }
  0x1c   :  { %p449_p11 = scmp.ne.s32.totalorder %s20_s8, %s448_s1  ;;  %p454_p13 = scmp.lt.s32.totalorder %s448_s1, %s448_s1 }
  0x1e   :  { %p455_p0 = por %p454_p13, %p453_p12 }
  0x20   :  { %p456_p1 = pnand %p455_p0, %p449_p11 }
  0x22   :  { %459 = shalt.err (!%p456_p1)
}
  0x23   :  { %22 = dma.hbm_to_vmem [thread:$0]  %s608_s0, 64, %s20_s8, [#allocation4]  }
  0x24   :  { %s460_s22 = scalar_lea.hbm %s611_s3, 1024 }
  0x25   :  { %p461_p2 = scmp.ne.s32.totalorder %s611_s3, %s460_s22  ;;  %p464_p3 = scmp.lt.u32.totalorder %s460_s22, %s611_s3 }
  0x27   :  { %p466_p4 = pnand %p464_p3, %p461_p2 }
  0x29   :  { %469 = shalt.err (!%p466_p4)
}
  0x2a   :  { %s470_s27 = scalar_lea.vmem %s43_s10, 1024  ;;  %p475_p6 = scmp.lt.s32.totalorder %s43_s10, %s43_s10 }
  0x2b   :  { %p471_p5 = scmp.ne.s32.totalorder %s43_s10, %s470_s27  ;;  %p476_p7 = scmp.lt.s32.totalorder %s470_s27, %s470_s27 }
  0x2d   :  { %p477_p8 = por %p476_p7, %p475_p6 }
  0x2f   :  { %p478_p9 = pnand %p477_p8, %p471_p5 }
  0x31   :  { %481 = shalt.err (!%p478_p9)
}
  0x32   :  { %48 = dma.hbm_to_vmem [thread:$0]  %s611_s3, 1024, %s43_s10, [#allocation7], %s511_s28, %s511_s28, %s512_s29  }
  0x33   :  { %504 = dma.done.wait [#allocation4], 64  }
  0x34   :  { %505 = vsyncadd [#allocation4], 4294967232 }
  0x35   :  { %506 = dma.done.wait [#allocation7], 2048  }
  0x36   :  { %507 = vsyncadd [#allocation7], 4294965248  ;;  %v515_v0 = vmov 0.0   ;;  %vm516_vm0 = vmmov 0   ;;  %v400_v1 = vld [vmem:[#allocation6] sm:$0xff]   ;;  %v401_v2 = vld [vmem:[#allocation6 + $0x8] sm:$0xff]  }
  0x37   :  { %352 = vmatprep.subr.bf16.mxu0 %v515_v0  ;;  %368 = vmatprep.mubr.msk.bf16.mxu0 %vm516_vm0, %v515_v0  ;;  %v402_v3 = vld [vmem:[#allocation6 + $0x10] sm:$0xff]   ;;  %v408_v4 = vld [vmem:[#allocation8] sm:$0xff]   ;;  %v403_v5 = vld [vmem:[#allocation6 + $0x18] sm:$0xff]   ;;  %s517_s7 = smov [#allocation9]  }
  0x38   :  { %372 = vmatprep.subr.bf16.mxu1 %v515_v0  ;;  %388 = vmatprep.mubr.msk.bf16.mxu1 %vm516_vm0, %v515_v0  ;;  %v409_v6 = vld [vmem:[#allocation8 + $0x8] sm:$0xff]   ;;  %v404_v7 = vld [vmem:[#allocation6 + $0x20] sm:$0xff]   ;;  %v410_v8 = vld [vmem:[#allocation8 + $0x10] sm:$0xff]   ;;  %s306_s8 = sshll.u32 %s517_s7, 4  ;;  %s307_s8 = int_to_ptr.vmem [resolvable:$true] %s306_s8 }
  0x39   :  { %353 = vmatpush3.bf16.msra.mxu0 %v400_v1  ;;  %373 = vmatpush3.bf16.msra.mxu1 %v408_v4  ;;  %v405_v9 = vld [vmem:[#allocation6 + $0x28] sm:$0xff]   ;;  %v411_v10 = vld [vmem:[#allocation8 + $0x18] sm:$0xff]   ;;  %v406_v11 = vld [vmem:[#allocation6 + $0x30] sm:$0xff]   ;;  %p487_p11 = scmp.lt.s32.totalorder %s307_s8, %s307_s8 }
  0x3a   :  { %354 = vmatprep.subr.bf16.mxu0 %v515_v0  ;;  %374 = vmatprep.subr.bf16.mxu1 %v515_v0  ;;  %v412_v12 = vld [vmem:[#allocation8 + $0x20] sm:$0xff]   ;;  %v407_v13 = vld [vmem:[#allocation6 + $0x38] sm:$0xff]   ;;  %v413_v14 = vld [vmem:[#allocation8 + $0x28] sm:$0xff]  }
  0x3b   :  { %v66_v15 = vld [vmem:[#allocation3] sm:$0xf]  ;;  %v414_v16 = vld [vmem:[#allocation8 + $0x30] sm:$0xff]  }
  0x3c   :  { %v415_v17 = vld [vmem:[#allocation8 + $0x38] sm:$0xff]  }
  0x3d   :  { %355 = vmatpush3.bf16.msra.mxu0 %v401_v2  ;;  %375 = vmatpush3.bf16.msra.mxu1 %v409_v6  ;;  %v316_v18 = vld [vmem:[%s610_s2] ss:$0 sm:$0xff]  ;;  %s482_s2 = scalar_lea.vmem %s307_s8, 128 }
  0x3e   :  { %356 = vmatprep.subr.bf16.mxu0 %v515_v0  ;;  %376 = vmatprep.subr.bf16.mxu1 %v515_v0  ;;  %v333_v26 = vld [vmem:[%s612_s4] ss:$0 sm:$0xff]  ;;  %p483_p10 = scmp.ne.s32.totalorder %s307_s8, %s482_s2  ;;  %p488_p12 = scmp.lt.s32.totalorder %s482_s2, %s482_s2 }
  0x40   :  { %p489_p13 = por %p488_p12, %p487_p11 }
  0x41   :  { %357 = vmatpush3.bf16.msra.mxu0 %v402_v3  ;;  %377 = vmatpush3.bf16.msra.mxu1 %v410_v8 }
  0x42   :  { %358 = vmatprep.subr.bf16.mxu0 %v515_v0  ;;  %378 = vmatprep.subr.bf16.mxu1 %v515_v0  ;;  %p490_p0 = pnand %p489_p13, %p483_p10 }
  0x45   :  { %359 = vmatpush3.bf16.msra.mxu0 %v403_v5  ;;  %379 = vmatpush3.bf16.msra.mxu1 %v411_v10 }
  0x46   :  { %360 = vmatprep.subr.bf16.mxu0 %v515_v0  ;;  %380 = vmatprep.subr.bf16.mxu1 %v515_v0 }
  0x49   :  { %361 = vmatpush3.bf16.msra.mxu0 %v404_v7  ;;  %381 = vmatpush3.bf16.msra.mxu1 %v412_v12 }
  0x4a   :  { %362 = vmatprep.subr.bf16.mxu0 %v515_v0  ;;  %382 = vmatprep.subr.bf16.mxu1 %v515_v0 }
  0x4d   :  { %363 = vmatpush3.bf16.msra.mxu0 %v405_v9  ;;  %383 = vmatpush3.bf16.msra.mxu1 %v413_v14 }
  0x4e   :  { %364 = vmatprep.subr.bf16.mxu0 %v515_v0  ;;  %384 = vmatprep.subr.bf16.mxu1 %v515_v0 }
  0x51   :  { %365 = vmatpush3.bf16.msra.mxu0 %v406_v11  ;;  %385 = vmatpush3.bf16.msra.mxu1 %v414_v16 }
  0x52   :  { %366 = vmatprep.subr.bf16.mxu0 %v515_v0  ;;  %386 = vmatprep.subr.bf16.mxu1 %v515_v0 }
  0x55   :  { %367 = vmatpush3.bf16.msra.mxu0 %v407_v13  ;;  %387 = vmatpush3.bf16.msra.mxu1 %v415_v17 }
  0x58   :  { %369 = vmatmul.mubr.bf16.vlgmr.msra.gmra.mrb[0].mxu0 %v66_v15 }
 0x12b   :  { %v172_v19 = vpop.f32.mrb[0].mxu0 }
 0x12c   :  { %v173_v20 = vadd.f32 %v316_v18, %v172_v19  ;;  %v370_v21 = vpop.f32.mrb[1].mxu0 }
 0x12d   :  { %v175_v22 = vpop.f32.mrb[2].mxu0 }
 0x12e   :  { %v178_v23 = vmax.f32 %v173_v20, 0.0  ;;  %v371_v24 = vpop.f32.mrb[3].mxu0 }
 0x130   :  { %v180_v25 = vpack.c.bf16 %v178_v23, %v178_v23 }
 0x132   :  { %389 = vmatmul.mubr.bf16.vlgmr.msra.gmra.mrb[0].mxu1 %v180_v25 }
 0x205   :  { %v279_v27 = vpop.f32.mrb[0].mxu1 }
 0x206   :  { %v298_v28 = vadd.f32 %v333_v26, %v279_v27  ;;  %v390_v29 = vpop.f32.mrb[1].mxu1 }
 0x207   :  { %v282_v30 = vpop.f32.mrb[2].mxu1 }
 0x208   :  { %299 = vst [vmem:[#allocation9] sm:$0xff] %v298_v28  ;;  %v391_v31 = vpop.f32.mrb[3].mxu1 }
 0x209   :  { %493 = shalt.err (!%p490_p0)
}
 0x20a   :  { %s494_s4 = scalar_lea.hbm %s613_s5, 128 }
 0x20b   :  { %p495_p1 = scmp.ne.s32.totalorder %s613_s5, %s494_s4  ;;  %p498_p2 = scmp.lt.u32.totalorder %s494_s4, %s613_s5 }
 0x20d   :  { %p500_p3 = pnand %p498_p2, %p495_p1 }
 0x20f   :  { %503 = shalt.err (!%p500_p3)
}
 0x210   :  { %309 = dma.vmem_to_hbm [thread:$0]  %s307_s8, 128, %s613_s5, [#allocation5]  }
 0x211   :  { %508 = dma.done.wait [#allocation5], 128  }
 0x212   :  { %509 = vsyncadd [#allocation5], 4294967168 }
 0x213   :  { %313 = vsyncpa [#allocation4], 1 }
 0x214   :  { %314 = vsyncpa [#allocation7], 1 }
 0x215   :  { %315 = vsyncpa [#allocation5], 1 }

</bundles_post_ra>
